<compile_context>
chip_gen: v5e
topology: v5e:2x2
jax: 0.10.0
libtpu: 0.0.40
codegen_flags: <defaults>
</compile_context>

<pallas_src>
import functools
import math

import jax
import jax.numpy as jnp
import numpy as np
from jax.experimental import pallas as pl
from jax.experimental.pallas import tpu as pltpu

REEIG_EPS = 1e-4    # modules.ReEig default eigenvalue threshold
BN_EPS = 1e-5       # SPD batch-norm variance epsilon
EIG_FLOOR = 1e-30   # keep log() argument strictly positive (f32 eigh can dip <= 0)


def _ceil8(n):
    return ((n + 7) // 8) * 8


# ----------------------------- Pallas kernels -------------------------------

def _bimap_kernel(x2_ref, w_ref, wtbd_ref, y_ref, *, batch, dp):
    """Whole-batch BiMap congruence Y_b = W^T X_b W as two stacked MXU matmuls.

    x2_ref  : (B*dp, dp)    zero-padded SPD matrices stacked along rows (dp % 8 == 0)
    w_ref   : (dp, dp)      zero-padded Stiefel weight (real block (din, dout))
    wtbd_ref: (B*dp, B*dp)  block-diagonal W^T (weight-only, built in glue) -- makes
                            the second contraction ONE matmul instead of B per-batch
                            pushes / per-block transposes; extra MACs are all zeros
    y_ref   : (B, dp, dp)   real data in the top-left (dout, dout) block
    """
    xw = jnp.dot(x2_ref[...], w_ref[...],
                 preferred_element_type=jnp.float32)            # (B*dp, dp): X_b W
    y = jnp.dot(wtbd_ref[...], xw,
                preferred_element_type=jnp.float32)             # (B*dp, dp): W^T X_b W
    y_ref[...] = y.reshape(batch, dp, dp)                       # 8-aligned split: free


def bimap(x, w):
    """x: (B, din, din), w: (din, dout) -> (B, dout, dout).  One gridless launch."""
    b, din, _ = x.shape
    dout = w.shape[1]
    dp = max(_ceil8(din), _ceil8(dout))           # 8-aligned per-batch row stride
    w_pad = jnp.zeros((dp, dp), jnp.float32).at[:din, :dout].set(w)
    # Block-diagonal W^T: depends only on the weight (precomputable once per update).
    wtbd = jnp.kron(jnp.eye(b, dtype=jnp.float32), w_pad.T)
    x_pad = jnp.zeros((b, dp, dp), jnp.float32).at[:, :din, :din].set(x)
    x2 = x_pad.reshape(b * dp, dp)
    y = pl.pallas_call(
        functools.partial(_bimap_kernel, batch=b, dp=dp),
        out_shape=jax.ShapeDtypeStruct((b, dp, dp), jnp.float32),
    )(x2, w_pad, wtbd)
    return y[:, :dout, :dout]


def _rescale_bimap_kernel(p_ref, wtbd_ref, u2_ref, lam_ref, y_ref, *,
                          batch, dnp, reeig_eps):
    """Fused SPD batch-norm rescale + ReEig of layer i with the BiMap of layer i+1.

      Z_b = U_b diag(s_b) U_b^T ,  s = max(lam^p, reeig_eps)
      Y_b = W^T Z_b W = (W^T U_b) diag(s_b) (W^T U_b)^T

    p_ref   : (1, 1) SMEM   rescale exponent p = std / sqrt(var + eps)
    wtbd_ref: (B*dnp, B*dp) block-diagonal padded W^T (weight-only, from glue)
    u2_ref  : (B*dp, dp)    zero-padded eigenvector matrices stacked along rows
    lam_ref : (B, 1, dp)    eigenvalues (padding lanes filled with 1.0)
    y_ref   : (B, dnp, dnp) real data in the top-left (dnext, dnext) block
    """
    dp = u2_ref.shape[-1]
    p = p_ref[0, 0]
    lam = jnp.maximum(lam_ref[...], EIG_FLOOR)                  # NaN guard for log
    s = jnp.maximum(jnp.exp(p * jnp.log(lam)), reeig_eps)       # lam^p, ReEig clamp
    # V^T = W^T U for the whole batch as ONE stacked MXU matmul.
    vt = jnp.dot(wtbd_ref[...], u2_ref[...],
                 preferred_element_type=jnp.float32)            # (B*dnp, dp)
    vt3 = vt.reshape(batch, dnp, dp)                            # aligned split: free
    # Y_b = (V^T diag(s)) V: batched contraction over the eigen index (lane dim).
    y_ref[...] = jnp.einsum('bik,bjk->bij', vt3 * s, vt3,
                            preferred_element_type=jnp.float32)


def rescale_bimap(u, lam, p, w, *, reeig_eps):
    """u: (B, d, d), lam: (B, d), p: (1,1), w: (d, dnext) -> (B, dnext, dnext)."""
    b, d, _ = u.shape
    dnext = w.shape[1]
    dp = _ceil8(d)
    dnp = _ceil8(dnext)
    wt_pad = jnp.zeros((dnp, dp), jnp.float32).at[:dnext, :d].set(w.T)
    wtbd = jnp.kron(jnp.eye(b, dtype=jnp.float32), wt_pad)       # (B*dnp, B*dp)
    u_pad = jnp.zeros((b, dp, dp), jnp.float32).at[:, :d, :d].set(u)
    u2 = u_pad.reshape(b * dp, dp)
    lam3 = jnp.ones((b, 1, dp), jnp.float32).at[:, 0, :d].set(lam)
    kernel = functools.partial(_rescale_bimap_kernel, batch=b, dnp=dnp,
                               reeig_eps=reeig_eps)
    y = pl.pallas_call(
        kernel,
        out_shape=jax.ShapeDtypeStruct((b, dnp, dnp), jnp.float32),
        in_specs=[
            pl.BlockSpec(memory_space=pltpu.MemorySpace.SMEM),   # p scalar
            pl.BlockSpec(memory_space=pltpu.MemorySpace.VMEM),   # block-diag W^T
            pl.BlockSpec(memory_space=pltpu.MemorySpace.VMEM),   # U (stacked)
            pl.BlockSpec(memory_space=pltpu.MemorySpace.VMEM),   # lam
        ],
        out_specs=pl.BlockSpec(memory_space=pltpu.MemorySpace.VMEM),
    )(p, wtbd, u2, lam3)
    return y[:, :dnext, :dnext]


def _rescale_logeig_linear_kernel(p_ref, u_ref, lam_ref, m_ref, o_ref, *, reeig_eps):
    """Fused last layer: BN rescale + ReEig + LogEig + half-vectorize + Linear.

    logits[b, c] = sum_{i,j} Z_b[i,j] * M_c[i,j]
    with Z_b = U_b diag(log(max(lam_b^p, reeig_eps))) U_b^T and M_c the (d, d)
    projection of lin_w row c (diag weights on the diagonal, sqrt(2)*weights on
    the strict lower triangle) -- exactly hvec(Z_b) @ lin_w[c], no gather needed.
    """
    p = p_ref[0, 0]
    # log(max(lam^p, eps)) == max(p*log(lam), log(eps)) (log monotone): one log,
    # no exp, no underflow of lam^p before the ReEig clamp.
    slog = jnp.maximum(p * jnp.log(jnp.maximum(lam_ref[...], EIG_FLOOR)),
                       math.log(reeig_eps))                     # (B, 1, d)
    u = u_ref[...]                                              # (B, d, d)
    z = jnp.einsum('bik,bjk->bij', u * slog, u,
                   preferred_element_type=jnp.float32)          # (B, d, d) log-matrix
    m = m_ref[...]                                              # (C, d, d)
    # Loop-free class reduction: broadcast-multiply then two lane reductions.
    prod = z[:, None, :, :] * m[None, :, :, :]                  # (B, C, d, d)
    o_ref[...] = prod.sum(axis=-1).sum(axis=-1).astype(o_ref.dtype)   # (B, C)


def rescale_logeig_linear(u, lam, p, m, *, reeig_eps):
    """u: (B, d, d), lam: (B, d), p: (1,1), m: (C, d, d) -> logits (B, C)."""
    b, d, _ = u.shape
    nclasses = m.shape[0]
    lam3 = lam[:, None, :]
    kernel = functools.partial(_rescale_logeig_linear_kernel, reeig_eps=reeig_eps)
    return pl.pallas_call(
        kernel,
        out_shape=jax.ShapeDtypeStruct((b, nclasses), jnp.float32),
        in_specs=[
            pl.BlockSpec(memory_space=pltpu.MemorySpace.SMEM),   # p scalar
            pl.BlockSpec(memory_space=pltpu.MemorySpace.VMEM),   # U
            pl.BlockSpec(memory_space=pltpu.MemorySpace.VMEM),   # lam
            pl.BlockSpec(memory_space=pltpu.MemorySpace.VMEM),   # projection M
        ],
        out_specs=pl.BlockSpec(memory_space=pltpu.MemorySpace.VMEM),
    )(p, u, lam3, m)


# ------------------------------ parameter init ------------------------------

def init_params(key, bimap_dims, nclasses):
    params = {"bimap_w": [], "bn_std": [], "bn_var": []}
    din = bimap_dims[0]
    for dout in bimap_dims[1:]:
        key, k = jax.random.split(key)
        a = jax.random.normal(k, (din, dout), dtype=jnp.float32)
        q, _ = jnp.linalg.qr(a)                      # Stiefel (semi-orthogonal) init
        params["bimap_w"].append(q)
        # AdaMomDomainSPDBatchNorm(learn_mean=False, learn_std=True, SCALAR):
        # initial std parameter and running variance are 1, running mean = I.
        params["bn_std"].append(jnp.ones((), jnp.float32))
        params["bn_var"].append(jnp.ones((), jnp.float32))
        din = dout
    d_last = bimap_dims[-1]
    tsdim = d_last * (d_last + 1) // 2
    key, k = jax.random.split(key)
    bound = math.sqrt(6.0 / (tsdim + nclasses))      # xavier_uniform_
    params["lin_w"] = jax.random.uniform(k, (nclasses, tsdim), jnp.float32,
                                         minval=-bound, maxval=bound)
    return params


def _hvec_projection(lin_w, d):
    """Fold the half-vectorization (diag, then sqrt(2)*strict lower tri) into the
    linear weights: returns M (C, d, d) with  hvec(Z) @ lin_w[c] == sum_ij Z*M[c].
    Built once from the weights in glue (static numpy indices, no data-path gather)."""
    rows, cols = np.tril_indices(d, -1)
    idx = np.zeros((d, d), dtype=np.int32)
    coef = np.zeros((d, d), dtype=np.float32)
    dr = np.arange(d)
    idx[dr, dr] = dr
    coef[dr, dr] = 1.0
    idx[rows, cols] = d + np.arange(rows.shape[0])
    coef[rows, cols] = math.sqrt(2.0)
    m = lin_w[:, idx.reshape(-1)].reshape(lin_w.shape[0], d, d)
    return (m * jnp.asarray(coef)[None]).astype(jnp.float32)


# --------------------------------- forward ----------------------------------

def spdsmnet_forward(params, x, domains, bimap_dims):
    """x: (B, 1, d0, d0) SPD matrices -> logits (B, nclasses).

    Eval-mode forward; with batch-norm running stats at their init values the
    per-domain whitening is the identity congruence, so `domains` does not alter
    the result (kept for signature fidelity).
    """
    # TODO(synk): training-mode Karcher-flow batch means / non-identity running
    # means of AdaMomDomainSPDBatchNorm would need an extra SPD inverse-sqrt
    # congruence (foldable into the BiMap weight) -- not exercised here.
    del domains
    l = x[:, 0]                                      # squeeze channel -> (B, d0, d0)
    nlayers = len(bimap_dims) - 1
    m = _hvec_projection(params["lin_w"], bimap_dims[-1])
    # First BiMap is the only congruence whose input is not an eigh factorization.
    l = bimap(l, params["bimap_w"][0])               # Pallas: W^T X W (whole batch)
    logits = None
    for i in range(nlayers):
        # TODO(synk): symmetric eigendecomposition has no Pallas/Mosaic primitive;
        # done in plain-JAX glue on the small d x d matrices (true end-to-end bottleneck).
        lam, u = jnp.linalg.eigh(l)
        p = (params["bn_std"][i]
             / jnp.sqrt(params["bn_var"][i] + BN_EPS)).reshape(1, 1).astype(jnp.float32)
        if i == nlayers - 1:
            # Fused: rescale + ReEig + LogEig + half-vectorize + Linear -> (B, C)
            logits = rescale_logeig_linear(u, lam, p, m, reeig_eps=REEIG_EPS)
        else:
            # Fused: rescale + ReEig of layer i + BiMap of layer i+1 (one launch,
            # no (B, d, d) HBM round trip for the intermediate Z).
            l = rescale_bimap(u, lam, p, params["bimap_w"][i + 1],
                              reeig_eps=REEIG_EPS)
    return logits


# --------------------------- pure-JAX reference ------------------------------

def spdsmnet_reference(params, x, bimap_dims):
    l = x[:, 0]
    nlayers = len(bimap_dims) - 1
    for i in range(nlayers):
        w = params["bimap_w"][i]
        l = jnp.einsum("ji,bjk,kl->bil", w, l, w, precision="highest")
        lam, u = jnp.linalg.eigh(l)
        # Mirror the kernel's NaN guard: f32 eigh of an SPD matrix can return a
        # non-positive eigenvalue; the kernel clamps before log/pow, so do the same
        # here to keep the tolerance test meaningful (deliberate divergence from
        # the f64 PyTorch reference, which would NaN in that case).
        lam = jnp.maximum(lam, EIG_FLOOR)
        p = params["bn_std"][i] / jnp.sqrt(params["bn_var"][i] + BN_EPS)
        s = jnp.maximum(lam ** p, REEIG_EPS)
        if i == nlayers - 1:
            s = jnp.log(s)
        l = jnp.einsum("bik,bk,bjk->bij", u, s, u, precision="highest")
    d = bimap_dims[-1]
    rows, cols = jnp.tril_indices(d, -1)
    vec = jnp.concatenate(
        [l[:, jnp.arange(d), jnp.arange(d)],
         math.sqrt(2.0) * l[:, rows, cols]], axis=-1)
    return jnp.einsum("bt,ct->bc", vec, params["lin_w"], precision="highest")


# ----------------------------------- main ------------------------------------

if __name__ == "__main__":
    bimap_dims = [20, 18, 15]   # SPD input dim 20, BiMap 20->18 then 18->15
    nclasses = 4
    batch = 8

    key = jax.random.PRNGKey(0)
    key, kx = jax.random.split(key)
    d0 = bimap_dims[0]
    a = jax.random.normal(kx, (batch, d0, d0), dtype=jnp.float32)
    # deterministic SPD inputs (min eigenvalue >= 0.5)
    x = a @ jnp.swapaxes(a, -1, -2) / d0 + 0.5 * jnp.eye(d0, dtype=jnp.float32)
    x = x[:, None, :, :]                              # (B, 1, d0, d0) like PyTorch
    domains = jnp.zeros((batch,), dtype=jnp.int32)

    params = init_params(key, bimap_dims, nclasses)

    logits = spdsmnet_forward(params, x, domains, bimap_dims)
    logits = jax.block_until_ready(logits)

    ref = spdsmnet_reference(params, x, bimap_dims)
    assert logits.shape == (batch, nclasses)
    assert bool(jnp.all(jnp.isfinite(logits)))
    np.testing.assert_allclose(np.asarray(logits), np.asarray(ref),
                               rtol=2e-2, atol=5e-3)
    print("KERNEL_OK")
</pallas_src>

<mosaic_0001>
module attributes {stable_mosaic.version = 11 : i64} {
  func.func @_bimap_kernel(%arg0: memref<192x24xf32, #tpu.memory_space<vmem>>, %arg1: memref<24x24xf32, #tpu.memory_space<vmem>>, %arg2: memref<192x192xf32, #tpu.memory_space<vmem>>, %arg3: memref<8x24x24xf32, #tpu.memory_space<vmem>>) attributes {dimension_semantics = [], scalar_prefetch = 0 : i64, scratch_operands = 0 : i64, tpu.core_type = #tpu.core_type<tc>} {
    %c0 = arith.constant 0 : index
    %c0_0 = arith.constant 0 : index
    %0 = vector.load %arg0[%c0, %c0_0] : memref<192x24xf32, #tpu.memory_space<vmem>>, vector<192x24xf32>
    %c0_1 = arith.constant 0 : index
    %c0_2 = arith.constant 0 : index
    %1 = vector.load %arg1[%c0_1, %c0_2] : memref<24x24xf32, #tpu.memory_space<vmem>>, vector<24x24xf32>
    %cst = arith.constant dense<0.000000e+00> : vector<192x24xf32>
    %2 = tpu.matmul %0, %1, %cst {dimension_numbers = #tpu.dot_dimension_numbers<[1], [0], [0], [1], [0, 0, 1, 1], [], []>} : vector<192x24xf32>, vector<24x24xf32>, vector<192x24xf32> -> vector<192x24xf32>
    %c0_3 = arith.constant 0 : index
    %c0_4 = arith.constant 0 : index
    %3 = vector.load %arg2[%c0_3, %c0_4] : memref<192x192xf32, #tpu.memory_space<vmem>>, vector<192x192xf32>
    %cst_5 = arith.constant dense<0.000000e+00> : vector<192x24xf32>
    %4 = tpu.matmul %3, %2, %cst_5 {dimension_numbers = #tpu.dot_dimension_numbers<[1], [0], [0], [1], [0, 0, 1, 1], [], []>} : vector<192x192xf32>, vector<192x24xf32>, vector<192x24xf32> -> vector<192x24xf32>
    %5 = vector.shape_cast %4 : vector<192x24xf32> to vector<8x24x24xf32>
    %c0_6 = arith.constant 0 : index
    %c0_7 = arith.constant 0 : index
    %c0_8 = arith.constant 0 : index
    %6 = vector.load %arg3[%c0_6, %c0_7, %c0_8] : memref<8x24x24xf32, #tpu.memory_space<vmem>>, vector<8x24x24xf32>
    tpu.vector_store %arg3[%c0_6, %c0_7, %c0_8], %5 {strides = array<i32>} : memref<8x24x24xf32, #tpu.memory_space<vmem>>, vector<8x24x24xf32>,
    return
  }
}

</mosaic_0001>

<bundles_post_ra>
// kernel: tpu_custom_call.1
= control target key start
LH: loop header
LB: loop body
LE: loop exit
PB: predicated region body
PF: predicated region fallthrough
CT: control target
= control target key end

     0   :  { %8 = vsyncpa [#allocation3], 0  ;;  %s894_s0 = inlined_call_operand.vmem [shape: f32[192,24], index: 0, kind: input, shape index: {}]   ;;  %s895_s1 = inlined_call_operand.vmem [shape: f32[24,24], index: 1, kind: input, shape index: {}]   ;;  %s896_s2 = inlined_call_operand.hbm [shape: f32[192,192], index: 2, kind: input, shape index: {}]   ;;  %s897_s3 = inlined_call_operand.hbm [shape: f32[8,24,24], index: 3, kind: output, shape index: {}]  }
   0x1   :  { %9 = vsyncpa [#allocation4], 0  ;;  %s18_s14 = sshll.u32 %s896_s2, 4  ;;  %s695_s15 = smov [#allocation2]   ;;  %s19_s14 = int_to_ptr.hbm [resolvable:$true] %s18_s14 }
   0x2   :  { %s20_s16 = sshll.u32 %s695_s15, 4  ;;  %s696_s17 = smov 256   ;;  %s21_s16 = int_to_ptr.vmem [resolvable:$true] %s20_s16 }
   0x3   :  { %s697_s18 = smov 16  }
   0x4   :  { %26 = dma.hbm_to_vmem [thread:$0]  %s19_s14, 6144, %s21_s16, [#allocation3], %s696_s17, %s696_s17, %s697_s18  }
   0x5   :  { %691 = dma.done.wait [#allocation3], 6144  }
   0x6   :  { %692 = vsyncadd [#allocation3], 4294961152  ;;  %v57_v0 = vld [vmem:[%s895_s1 + $0x10] sm:$0xff]  ;;  %v56_v1 = vld [vmem:[%s895_s1 + $0x8] sm:$0xff]  ;;  %vm58_vm0 = vcmask 195584   ;;  %vm268_vm1 = vcmask 523264  }
   0x7   :  { %144 = vmatpush.msra.mxu0 %v57_v0  ;;  %610 = vmatpush.msra.mxu3 %v57_v0  ;;  %v55_v2 = vld [vmem:[%s895_s1] sm:$0xff]  ;;  %v32_v4 = vld [vmem:[%s894_s0 + $0x8] sm:$0xff]  ;;  %v33_v5 = vld [vmem:[%s894_s0 + $0x10] sm:$0xff]  ;;  %s549_s18 = sshll.u32 %s897_s3, 4  ;;  %s699_s19 = smov 128   ;;  %s550_s18 = int_to_ptr.hbm [resolvable:$true] %s549_s18 }
   0x8   :  { %v31_v3 = vld [vmem:[%s894_s0] sm:$0xff]  ;;  %v34_v6 = vld [vmem:[%s894_s0 + $0x18] sm:$0xff]  ;;  %v36_v8 = vld [vmem:[%s894_s0 + $0x28] sm:$0xff]  ;;  %s700_s20 = smov 8  }
   0x9   :  { %145 = vmatpush.msra.mxu0 %v56_v1  ;;  %611 = vmatpush.msra.mxu3 %v56_v1  ;;  %v35_v7 = vld [vmem:[%s894_s0 + $0x20] sm:$0xff]  ;;  %v37_v9 = vld [vmem:[%s894_s0 + $0x30] sm:$0xff]  ;;  %v38_v11 = vld [vmem:[%s894_s0 + $0x38] sm:$0xff] }
   0xa   :  { %v51_v10 = vld [vmem:[%s894_s0 + $0xa0] sm:$0xff]  ;;  %v52_v12 = vld [vmem:[%s894_s0 + $0xa8] sm:$0xff]  ;;  %v53_v14 = vld [vmem:[%s894_s0 + $0xb0] sm:$0xff] }
   0xb   :  { %146 = vmatpush.msra.mxu0 %v55_v2  ;;  %612 = vmatpush.msra.mxu3 %v55_v2  ;;  %v39_v13 = vld [vmem:[%s894_s0 + $0x40] sm:$0xff]  ;;  %v40_v15 = vld [vmem:[%s894_s0 + $0x48] sm:$0xff]  ;;  %v54_v16 = vld [vmem:[%s894_s0 + $0xb8] sm:$0xff] }
   0xc   :  { %562 = vmatmul.msk.f32.vlgmr.msra.gmra.mxu0 %vm58_vm0, %v31_v3  ;;  %582 = vmatmul.msk.f32.vlgmr.msra.gmra.mxu3 %vm58_vm0, %v51_v10  ;;  %v41_v17 = vld [vmem:[%s894_s0 + $0x50] sm:$0xff]  ;;  %v42_v18 = vld [vmem:[%s894_s0 + $0x58] sm:$0xff]  ;;  %v43_v19 = vld [vmem:[%s894_s0 + $0x60] sm:$0xff] }
   0xd   :  { %v44_v20 = vld [vmem:[%s894_s0 + $0x68] sm:$0xff]  ;;  %v45_v21 = vld [vmem:[%s894_s0 + $0x70] sm:$0xff]  ;;  %v46_v22 = vld [vmem:[%s894_s0 + $0x78] sm:$0xff] }
   0xe   :  { %v47_v24 = vld [vmem:[%s894_s0 + $0x80] sm:$0xff]  ;;  %v48_v26 = vld [vmem:[%s894_s0 + $0x88] sm:$0xff]  ;;  %v49_v28 = vld [vmem:[%s894_s0 + $0x90] sm:$0xff] }
   0xf   :  { %v50_v30 = vld [vmem:[%s894_s0 + $0x98] sm:$0xff]  ;;  %v220_v50 = vld [vmem:[#allocation2] sm:$0xff]  ;;  %v254_v51 = vld [vmem:[#allocation2 + $0x110] sm:$0xff]  ;;  %s698_s0 = smov [#allocation5]  }
  0x10   :  { %v221_v53 = vld [vmem:[#allocation2 + $0x8] sm:$0xff]  ;;  %v222_v54 = vld [vmem:[#allocation2 + $0x10] sm:$0xff]  ;;  %v256_v55 = vld [vmem:[#allocation2 + $0x120] sm:$0xff]  ;;  %s547_s15 = sshll.u32 %s698_s0, 4  ;;  %s548_s15 = int_to_ptr.vmem [resolvable:$true] %s547_s15 }
  0x11   :  { %v223_v56 = vld [vmem:[#allocation2 + $0x18] sm:$0xff]  ;;  %v224_v57 = vld [vmem:[#allocation2 + $0x20] sm:$0xff]  ;;  %v258_v58 = vld [vmem:[#allocation2 + $0x130] sm:$0xff] }
  0x12   :  { %v225_v59 = vld [vmem:[#allocation2 + $0x28] sm:$0xff]  ;;  %v226_v60 = vld [vmem:[#allocation2 + $0x30] sm:$0xff]  ;;  %v260_v61 = vld [vmem:[#allocation2 + $0x140] sm:$0xff] }
  0x13   :  { %v227_v62 = vld [vmem:[#allocation2 + $0x38] sm:$0xff]  ;;  %v228_v63 = vld [vmem:[#allocation2 + $0x40] sm:$0xff]  ;;  %v262_v0 = vld [vmem:[#allocation2 + $0x150] sm:$0xff] }
  0x14   :  { %563 = vmatmul.msk.f32.gmra.mxu0 %vm58_vm0, %v32_v4  ;;  %583 = vmatmul.msk.f32.gmra.mxu3 %vm58_vm0, %v52_v12  ;;  %v229_v1 = vld [vmem:[#allocation2 + $0x48] sm:$0xff]  ;;  %v230_v2 = vld [vmem:[#allocation2 + $0x50] sm:$0xff]  ;;  %v264_v3 = vld [vmem:[#allocation2 + $0x160] sm:$0xff] }
  0x15   :  { %v231_v4 = vld [vmem:[#allocation2 + $0x58] sm:$0xff]  ;;  %v261_v12 = vld [vmem:[#allocation2 + $0x148] sm:$0xff] }
  0x16   :  { %v235_v10 = vld [vmem:[#allocation2 + $0x78] sm:$0xff] }
  0x1c   :  { %564 = vmatmul.msk.f32.gmra.mxu0 %vm58_vm0, %v33_v5  ;;  %584 = vmatmul.msk.f32.gmra.mxu3 %vm58_vm0, %v53_v14  ;;  %v232_v5 = vld [vmem:[#allocation2 + $0x60] sm:$0xff]  ;;  %v238_v14 = vld [vmem:[#allocation2 + $0x90] sm:$0xff] }
  0x24   :  { %565 = vmatmul.msk.f32.gmra.mxu0 %vm58_vm0, %v34_v6  ;;  %585 = vmatmul.msk.f32.gmra.mxu3 %vm58_vm0, %v54_v16  ;;  %v266_v6 = vld [vmem:[#allocation2 + $0x170] sm:$0xff]  ;;  %v239_v16 = vld [vmem:[#allocation2 + $0x98] sm:$0xff] }
  0x2c   :  { %566 = vmatmul.msk.f32.gmra.mxu0 %vm58_vm0, %v35_v7  ;;  %v233_v7 = vld [vmem:[#allocation2 + $0x68] sm:$0xff] }
  0x34   :  { %567 = vmatmul.msk.f32.gmra.mxu0 %vm58_vm0, %v36_v8  ;;  %v234_v8 = vld [vmem:[#allocation2 + $0x70] sm:$0xff] }
  0x3c   :  { %568 = vmatmul.msk.f32.gmra.mxu0 %vm58_vm0, %v37_v9  ;;  %v259_v9 = vld [vmem:[#allocation2 + $0x138] sm:$0xff] }
  0x44   :  { %569 = vmatmul.msk.f32.gmra.mxu0 %vm58_vm0, %v38_v11  ;;  %v236_v11 = vld [vmem:[#allocation2 + $0x80] sm:$0xff] }
  0x4c   :  { %570 = vmatmul.msk.f32.gmra.mxu0 %vm58_vm0, %v39_v13  ;;  %v237_v13 = vld [vmem:[#allocation2 + $0x88] sm:$0xff] }
  0x54   :  { %571 = vmatmul.msk.f32.gmra.mxu0 %vm58_vm0, %v40_v15  ;;  %v263_v15 = vld [vmem:[#allocation2 + $0x158] sm:$0xff] }
  0x5c   :  { %572 = vmatmul.msk.f32.gmra.mxu0 %vm58_vm0, %v41_v17  ;;  %v240_v17 = vld [vmem:[#allocation2 + $0xa0] sm:$0xff] }
  0x64   :  { %573 = vmatmul.msk.f32.gmra.mxu0 %vm58_vm0, %v42_v18  ;;  %v265_v18 = vld [vmem:[#allocation2 + $0x168] sm:$0xff] }
  0x6c   :  { %574 = vmatmul.msk.f32.gmra.mxu0 %vm58_vm0, %v43_v19  ;;  %v241_v19 = vld [vmem:[#allocation2 + $0xa8] sm:$0xff] }
  0x74   :  { %575 = vmatmul.msk.f32.gmra.mxu0 %vm58_vm0, %v44_v20  ;;  %v242_v20 = vld [vmem:[#allocation2 + $0xb0] sm:$0xff] }
  0x7c   :  { %576 = vmatmul.msk.f32.gmra.mxu0 %vm58_vm0, %v45_v21  ;;  %v267_v21 = vld [vmem:[#allocation2 + $0x178] sm:$0xff] }
  0x84   :  { %577 = vmatmul.msk.f32.gmra.mxu0 %vm58_vm0, %v46_v22  ;;  %v243_v22 = vld [vmem:[#allocation2 + $0xb8] sm:$0xff] }
  0x89   :  { %v813_v23 = vpop.f32.mrf.mxu0 }
  0x8c   :  { %578 = vmatmul.msk.f32.gmra.mxu0 %vm58_vm0, %v47_v24  ;;  %v245_v24 = vld [vmem:[#allocation2 + $0xc8] sm:$0xff] }
  0x8f   :  { %v831_v35 = vpop.f32.mrf.mxu3 }
  0x91   :  { %v151_v25 = vpop.f32.mrf.mxu0 }
  0x94   :  { %579 = vmatmul.msk.f32.gmra.mxu0 %vm58_vm0, %v48_v26  ;;  %v247_v26 = vld [vmem:[#allocation2 + $0xd8] sm:$0xff] }
  0x97   :  { %v211_v37 = vpop.f32.mrf.mxu3 }
  0x99   :  { %v154_v27 = vpop.f32.mrf.mxu0 }
  0x9c   :  { %580 = vmatmul.msk.f32.gmra.mxu0 %vm58_vm0, %v49_v28  ;;  %v249_v28 = vld [vmem:[#allocation2 + $0xe8] sm:$0xff] }
  0x9f   :  { %v214_v39 = vpop.f32.mrf.mxu3 }
  0xa1   :  { %v157_v29 = vpop.f32.mrf.mxu0 }
  0xa4   :  { %581 = vmatmul.msk.f32.gmra.mxu0 %vm58_vm0, %v50_v30  ;;  %v251_v30 = vld [vmem:[#allocation2 + $0xf8] sm:$0xff] }
  0xa7   :  { %v217_v41 = vpop.f32.mrf.mxu3 }
  0xa8   :  { %438 = vmatpush.msra.mxu2 %v217_v41 }
  0xa9   :  { %v160_v31 = vpop.f32.mrf.mxu0 }
  0xaa   :  { %439 = vmatpush.msra.mxu2 %v214_v39 }
  0xac   :  { %440 = vmatpush.msra.mxu2 %v211_v37 }
  0xae   :  { %441 = vmatpush.msra.mxu2 %v831_v35 }
  0xb1   :  { %v163_v32 = vpop.f32.mrf.mxu0 }
  0xb9   :  { %v166_v33 = vpop.f32.mrf.mxu0 }
  0xc1   :  { %v169_v34 = vpop.f32.mrf.mxu0 }
  0xc9   :  { %v172_v36 = vpop.f32.mrf.mxu0 }
  0xd1   :  { %v175_v38 = vpop.f32.mrf.mxu0 }
  0xd9   :  { %v178_v40 = vpop.f32.mrf.mxu0 }
  0xe1   :  { %v181_v42 = vpop.f32.mrf.mxu0 }
  0xe9   :  { %v184_v43 = vpop.f32.mrf.mxu0 }
  0xf1   :  { %v187_v44 = vpop.f32.mrf.mxu0 }
  0xf9   :  { %v190_v45 = vpop.f32.mrf.mxu0 }
 0x101   :  { %v193_v46 = vpop.f32.mrf.mxu0 }
 0x102   :  { %341 = vmatpush.msra.mxu1 %v193_v46  ;;  %613 = vmatpush.msrb.mxu3 %v193_v46 }
 0x104   :  { %342 = vmatpush.msra.mxu1 %v190_v45  ;;  %614 = vmatpush.msrb.mxu3 %v190_v45 }
 0x106   :  { %343 = vmatpush.msra.mxu1 %v187_v44  ;;  %615 = vmatpush.msrb.mxu3 %v187_v44  ;;  %v257_v44 = vld [vmem:[#allocation2 + $0x128] sm:$0xff] }
 0x108   :  { %344 = vmatpush.msra.mxu1 %v184_v43  ;;  %616 = vmatpush.msrb.mxu3 %v184_v43 }
 0x109   :  { %v196_v47 = vpop.f32.mrf.mxu0 }
 0x10a   :  { %345 = vmatpush.msra.mxu1 %v181_v42  ;;  %617 = vmatpush.msrb.mxu3 %v181_v42 }
 0x10c   :  { %346 = vmatpush.msra.mxu1 %v178_v40  ;;  %618 = vmatpush.msrb.mxu3 %v178_v40 }
 0x10e   :  { %347 = vmatpush.msra.mxu1 %v175_v38  ;;  %619 = vmatpush.msrb.mxu3 %v175_v38 }
 0x110   :  { %348 = vmatpush.msra.mxu1 %v172_v36  ;;  %620 = vmatpush.msrb.mxu3 %v172_v36 }
 0x111   :  { %v199_v48 = vpop.f32.mrf.mxu0 }
 0x112   :  { %349 = vmatpush.msra.mxu1 %v169_v34  ;;  %621 = vmatpush.msrb.mxu3 %v169_v34  ;;  %v253_v34 = vld [vmem:[#allocation2 + $0x108] sm:$0xff] }
 0x114   :  { %350 = vmatpush.msra.mxu1 %v166_v33  ;;  %622 = vmatpush.msrb.mxu3 %v166_v33 }
 0x116   :  { %351 = vmatpush.msra.mxu1 %v163_v32  ;;  %623 = vmatpush.msrb.mxu3 %v163_v32  ;;  %v252_v32 = vld [vmem:[#allocation2 + $0x100] sm:$0xff] }
 0x118   :  { %352 = vmatpush.msra.mxu1 %v160_v31  ;;  %624 = vmatpush.msrb.mxu3 %v160_v31 }
 0x119   :  { %v202_v49 = vpop.f32.mrf.mxu0 }
 0x11a   :  { %353 = vmatpush.msra.mxu1 %v157_v29  ;;  %625 = vmatpush.msrb.mxu3 %v157_v29  ;;  %v250_v29 = vld [vmem:[#allocation2 + $0xf0] sm:$0xff] }
 0x11c   :  { %354 = vmatpush.msra.mxu1 %v154_v27  ;;  %626 = vmatpush.msrb.mxu3 %v154_v27  ;;  %v248_v27 = vld [vmem:[#allocation2 + $0xe0] sm:$0xff] }
 0x11e   :  { %355 = vmatpush.msra.mxu1 %v151_v25  ;;  %627 = vmatpush.msrb.mxu3 %v151_v25  ;;  %v246_v25 = vld [vmem:[#allocation2 + $0xd0] sm:$0xff] }
 0x120   :  { %356 = vmatpush.msra.mxu1 %v813_v23  ;;  %628 = vmatpush.msrb.mxu3 %v813_v23  ;;  %v244_v23 = vld [vmem:[#allocation2 + $0xc0] sm:$0xff] }
 0x121   :  { %v205_v52 = vpop.f32.mrf.mxu0  ;;  %357 = vmatmul.f32.vlgmr.msra.gmra.mxu1 %v220_v50  ;;  %408 = vmatmul.f32.vlgmr.msrb.gmra.mxu3 %v254_v51 }
 0x122   :  { %629 = vmatpush.msra.mxu3 %v217_v41  ;;  %442 = vmatpush.msra.mxu2 %v205_v52 }
 0x124   :  { %630 = vmatpush.msra.mxu3 %v214_v39  ;;  %443 = vmatpush.msra.mxu2 %v202_v49  ;;  %v255_v39 = vld [vmem:[#allocation2 + $0x118] sm:$0xff] }
 0x126   :  { %631 = vmatpush.msra.mxu3 %v211_v37  ;;  %444 = vmatpush.msra.mxu2 %v199_v48 }
 0x128   :  { %632 = vmatpush.msra.mxu3 %v831_v35  ;;  %445 = vmatpush.msra.mxu2 %v196_v47 }
 0x129   :  { %586 = vmatmul.msk.f32.vlgmr.msra.gmra.mxu2 %vm268_vm1, %v221_v53  ;;  %360 = vmatmul.f32.gmra.mxu1 %v222_v54 }
 0x12a   :  { %633 = vmatpush.msra.mxu3 %v205_v52 }
 0x12b   :  { %411 = vmatmul.f32.gmra.mxu3 %v256_v55 }
 0x12c   :  { %634 = vmatpush.msra.mxu3 %v202_v49 }
 0x12e   :  { %635 = vmatpush.msra.mxu3 %v199_v48 }
 0x130   :  { %636 = vmatpush.msra.mxu3 %v196_v47 }
 0x131   :  { %587 = vmatmul.msk.f32.gmra.mxu2 %vm268_vm1, %v223_v56  ;;  %363 = vmatmul.f32.gmra.mxu1 %v224_v57 }
 0x133   :  { %414 = vmatmul.f32.gmra.mxu3 %v258_v58 }
 0x139   :  { %588 = vmatmul.msk.f32.gmra.mxu2 %vm268_vm1, %v225_v59  ;;  %366 = vmatmul.f32.gmra.mxu1 %v226_v60 }
 0x13b   :  { %417 = vmatmul.f32.gmra.mxu3 %v260_v61 }
 0x141   :  { %589 = vmatmul.msk.f32.gmra.mxu2 %vm268_vm1, %v227_v62  ;;  %369 = vmatmul.f32.gmra.mxu1 %v228_v63 }
 0x143   :  { %420 = vmatmul.f32.gmra.mxu3 %v262_v0 }
 0x149   :  { %590 = vmatmul.msk.f32.gmra.mxu2 %vm268_vm1, %v229_v1  ;;  %372 = vmatmul.f32.gmra.mxu1 %v230_v2 }
 0x14b   :  { %423 = vmatmul.f32.gmra.mxu3 %v264_v3 }
 0x151   :  { %591 = vmatmul.msk.f32.gmra.mxu2 %vm268_vm1, %v231_v4  ;;  %375 = vmatmul.f32.gmra.mxu1 %v232_v5 }
 0x153   :  { %426 = vmatmul.f32.gmra.mxu3 %v266_v6 }
 0x159   :  { %592 = vmatmul.msk.f32.gmra.mxu2 %vm268_vm1, %v233_v7  ;;  %378 = vmatmul.f32.gmra.mxu1 %v234_v8 }
 0x15b   :  { %605 = vmatmul.msk.f32.vlgmr.msra.gmra.mxu3 %vm268_vm1, %v259_v9 }
 0x161   :  { %593 = vmatmul.msk.f32.gmra.mxu2 %vm268_vm1, %v235_v10  ;;  %381 = vmatmul.f32.gmra.mxu1 %v236_v11 }
 0x163   :  { %606 = vmatmul.msk.f32.gmra.mxu3 %vm268_vm1, %v261_v12 }
 0x169   :  { %594 = vmatmul.msk.f32.gmra.mxu2 %vm268_vm1, %v237_v13  ;;  %384 = vmatmul.f32.gmra.mxu1 %v238_v14 }
 0x16b   :  { %607 = vmatmul.msk.f32.gmra.mxu3 %vm268_vm1, %v263_v15 }
 0x171   :  { %595 = vmatmul.msk.f32.gmra.mxu2 %vm268_vm1, %v239_v16  ;;  %387 = vmatmul.f32.gmra.mxu1 %v240_v17 }
 0x173   :  { %608 = vmatmul.msk.f32.gmra.mxu3 %vm268_vm1, %v265_v18 }
 0x179   :  { %596 = vmatmul.msk.f32.gmra.mxu2 %vm268_vm1, %v241_v19  ;;  %390 = vmatmul.f32.gmra.mxu1 %v242_v20 }
 0x17b   :  { %609 = vmatmul.msk.f32.gmra.mxu3 %vm268_vm1, %v267_v21 }
 0x181   :  { %597 = vmatmul.msk.f32.gmra.mxu2 %vm268_vm1, %v243_v22  ;;  %393 = vmatmul.f32.gmra.mxu1 %v244_v23 }
 0x189   :  { %598 = vmatmul.msk.f32.gmra.mxu2 %vm268_vm1, %v245_v24  ;;  %396 = vmatmul.f32.gmra.mxu1 %v246_v25 }
 0x191   :  { %599 = vmatmul.msk.f32.gmra.mxu2 %vm268_vm1, %v247_v26  ;;  %399 = vmatmul.f32.gmra.mxu1 %v248_v27 }
 0x199   :  { %600 = vmatmul.msk.f32.gmra.mxu2 %vm268_vm1, %v249_v28  ;;  %402 = vmatmul.f32.gmra.mxu1 %v250_v29 }
 0x19e   :  { %v358_v31 = vpop.f32.mrf.mxu1 }
 0x1a1   :  { %601 = vmatmul.msk.f32.gmra.mxu2 %vm268_vm1, %v251_v30  ;;  %405 = vmatmul.f32.gmra.mxu1 %v252_v32 }
 0x1a4   :  { %v858_v33 = vpop.f32.mrf.mxu3 }
 0x1a6   :  { %v361_v35 = vpop.f32.mrf.mxu1 }
 0x1a9   :  { %602 = vmatmul.msk.f32.gmra.mxu2 %vm268_vm1, %v253_v34 }
 0x1ac   :  { %v447_v36 = vpop.f32.mrf.mxu2 }
 0x1ad   :  { %v448_v37 = vadd.f32 %v447_v36, %v358_v31 }
 0x1ae   :  { %v861_v38 = vpop.f32.mrf.mxu3  ;;  %v364_v40 = vpop.f32.mrf.mxu1 }
 0x1af   :  { %519 = vst.msk [vmem:[#allocation5] sm:$0xff] %vm58_vm0, %v448_v37 }
 0x1b1   :  { %603 = vmatmul.msk.f32.gmra.mxu2 %vm268_vm1, %v255_v39 }
 0x1b4   :  { %v450_v41 = vpop.f32.mrf.mxu2 }
 0x1b5   :  { %v451_v42 = vadd.f32 %v450_v41, %v361_v35 }
 0x1b6   :  { %v415_v43 = vpop.f32.mrf.mxu3  ;;  %v367_v45 = vpop.f32.mrf.mxu1 }
 0x1b7   :  { %520 = vst.msk [vmem:[#allocation5 + $0x8] sm:$0xff] %vm58_vm0, %v451_v42 }
 0x1b9   :  { %604 = vmatmul.msk.f32.gmra.mxu2 %vm268_vm1, %v257_v44 }
 0x1bc   :  { %v453_v46 = vpop.f32.mrf.mxu2 }
 0x1bd   :  { %v454_v47 = vadd.f32 %v453_v46, %v364_v40 }
 0x1be   :  { %v418_v48 = vpop.f32.mrf.mxu3  ;;  %v370_v49 = vpop.f32.mrf.mxu1 }
 0x1bf   :  { %521 = vst.msk [vmem:[#allocation5 + $0x10] sm:$0xff] %vm58_vm0, %v454_v47 }
 0x1c4   :  { %v456_v50 = vpop.f32.mrf.mxu2 }
 0x1c5   :  { %v457_v51 = vadd.f32 %v456_v50, %v367_v45 }
 0x1c6   :  { %v421_v52 = vpop.f32.mrf.mxu3  ;;  %v373_v53 = vpop.f32.mrf.mxu1 }
 0x1c7   :  { %522 = vst.msk [vmem:[#allocation5 + $0x18] sm:$0xff] %vm58_vm0, %v457_v51 }
 0x1cc   :  { %v459_v54 = vpop.f32.mrf.mxu2 }
 0x1cd   :  { %v460_v55 = vadd.f32 %v459_v54, %v370_v49 }
 0x1ce   :  { %v424_v56 = vpop.f32.mrf.mxu3  ;;  %v376_v57 = vpop.f32.mrf.mxu1 }
 0x1cf   :  { %523 = vst.msk [vmem:[#allocation5 + $0x20] sm:$0xff] %vm58_vm0, %v460_v55 }
 0x1d4   :  { %v462_v58 = vpop.f32.mrf.mxu2 }
 0x1d5   :  { %v463_v59 = vadd.f32 %v462_v58, %v373_v53 }
 0x1d6   :  { %v427_v60 = vpop.f32.mrf.mxu3  ;;  %v379_v61 = vpop.f32.mrf.mxu1 }
 0x1d7   :  { %524 = vst.msk [vmem:[#allocation5 + $0x28] sm:$0xff] %vm58_vm0, %v463_v59 }
 0x1dc   :  { %v465_v62 = vpop.f32.mrf.mxu2 }
 0x1dd   :  { %v466_v63 = vadd.f32 %v465_v62, %v376_v57 }
 0x1de   :  { %v504_v0 = vpop.f32.mrf.mxu3  ;;  %v382_v2 = vpop.f32.mrf.mxu1 }
 0x1df   :  { %v505_v1 = vadd.f32 %v504_v0, %v415_v43  ;;  %525 = vst.msk [vmem:[#allocation5 + $0x30] sm:$0xff] %vm58_vm0, %v466_v63 }
 0x1e1   :  { %538 = vst.msk [vmem:[#allocation5 + $0x98] sm:$0xff] %vm58_vm0, %v505_v1 }
 0x1e4   :  { %v468_v3 = vpop.f32.mrf.mxu2 }
 0x1e5   :  { %v469_v4 = vadd.f32 %v468_v3, %v379_v61 }
 0x1e6   :  { %v507_v5 = vpop.f32.mrf.mxu3  ;;  %v385_v7 = vpop.f32.mrf.mxu1 }
 0x1e7   :  { %v508_v6 = vadd.f32 %v507_v5, %v418_v48  ;;  %526 = vst.msk [vmem:[#allocation5 + $0x38] sm:$0xff] %vm58_vm0, %v469_v4 }
 0x1e9   :  { %539 = vst.msk [vmem:[#allocation5 + $0xa0] sm:$0xff] %vm58_vm0, %v508_v6 }
 0x1ec   :  { %v471_v8 = vpop.f32.mrf.mxu2 }
 0x1ed   :  { %v472_v9 = vadd.f32 %v471_v8, %v382_v2 }
 0x1ee   :  { %v510_v10 = vpop.f32.mrf.mxu3  ;;  %v388_v12 = vpop.f32.mrf.mxu1 }
 0x1ef   :  { %v511_v11 = vadd.f32 %v510_v10, %v421_v52  ;;  %527 = vst.msk [vmem:[#allocation5 + $0x40] sm:$0xff] %vm58_vm0, %v472_v9 }
 0x1f1   :  { %540 = vst.msk [vmem:[#allocation5 + $0xa8] sm:$0xff] %vm58_vm0, %v511_v11 }
 0x1f4   :  { %v474_v13 = vpop.f32.mrf.mxu2 }
 0x1f5   :  { %v475_v14 = vadd.f32 %v474_v13, %v385_v7 }
 0x1f6   :  { %v513_v15 = vpop.f32.mrf.mxu3  ;;  %v391_v17 = vpop.f32.mrf.mxu1 }
 0x1f7   :  { %v514_v16 = vadd.f32 %v513_v15, %v424_v56  ;;  %528 = vst.msk [vmem:[#allocation5 + $0x48] sm:$0xff] %vm58_vm0, %v475_v14 }
 0x1f9   :  { %541 = vst.msk [vmem:[#allocation5 + $0xb0] sm:$0xff] %vm58_vm0, %v514_v16 }
 0x1fc   :  { %v477_v18 = vpop.f32.mrf.mxu2 }
 0x1fd   :  { %v478_v19 = vadd.f32 %v477_v18, %v388_v12 }
 0x1fe   :  { %v516_v20 = vpop.f32.mrf.mxu3  ;;  %v394_v22 = vpop.f32.mrf.mxu1 }
 0x1ff   :  { %v517_v21 = vadd.f32 %v516_v20, %v427_v60  ;;  %529 = vst.msk [vmem:[#allocation5 + $0x50] sm:$0xff] %vm58_vm0, %v478_v19 }
 0x201   :  { %542 = vst.msk [vmem:[#allocation5 + $0xb8] sm:$0xff] %vm58_vm0, %v517_v21 }
 0x204   :  { %v480_v23 = vpop.f32.mrf.mxu2 }
 0x205   :  { %v481_v24 = vadd.f32 %v480_v23, %v391_v17 }
 0x206   :  { %v397_v26 = vpop.f32.mrf.mxu1 }
 0x207   :  { %530 = vst.msk [vmem:[#allocation5 + $0x58] sm:$0xff] %vm58_vm0, %v481_v24 }
 0x20c   :  { %v483_v25 = vpop.f32.mrf.mxu2 }
 0x20d   :  { %v484_v27 = vadd.f32 %v483_v25, %v394_v22 }
 0x20e   :  { %v400_v30 = vpop.f32.mrf.mxu1 }
 0x20f   :  { %531 = vst.msk [vmem:[#allocation5 + $0x60] sm:$0xff] %vm58_vm0, %v484_v27 }
 0x214   :  { %v486_v28 = vpop.f32.mrf.mxu2 }
 0x215   :  { %v487_v29 = vadd.f32 %v486_v28, %v397_v26 }
 0x216   :  { %v403_v34 = vpop.f32.mrf.mxu1 }
 0x217   :  { %532 = vst.msk [vmem:[#allocation5 + $0x68] sm:$0xff] %vm58_vm0, %v487_v29 }
 0x21c   :  { %v489_v31 = vpop.f32.mrf.mxu2 }
 0x21d   :  { %v490_v32 = vadd.f32 %v489_v31, %v400_v30 }
 0x21e   :  { %v406_v37 = vpop.f32.mrf.mxu1 }
 0x21f   :  { %533 = vst.msk [vmem:[#allocation5 + $0x70] sm:$0xff] %vm58_vm0, %v490_v32 }
 0x224   :  { %v492_v35 = vpop.f32.mrf.mxu2 }
 0x225   :  { %v493_v36 = vadd.f32 %v492_v35, %v403_v34 }
 0x227   :  { %534 = vst.msk [vmem:[#allocation5 + $0x78] sm:$0xff] %vm58_vm0, %v493_v36 }
 0x22c   :  { %v495_v39 = vpop.f32.mrf.mxu2 }
 0x22d   :  { %v496_v40 = vadd.f32 %v495_v39, %v406_v37 }
 0x22f   :  { %535 = vst.msk [vmem:[#allocation5 + $0x80] sm:$0xff] %vm58_vm0, %v496_v40 }
 0x234   :  { %v498_v41 = vpop.f32.mrf.mxu2 }
 0x235   :  { %v499_v42 = vadd.f32 %v498_v41, %v858_v33 }
 0x237   :  { %536 = vst.msk [vmem:[#allocation5 + $0x88] sm:$0xff] %vm58_vm0, %v499_v42 }
 0x23c   :  { %v501_v43 = vpop.f32.mrf.mxu2 }
 0x23d   :  { %v502_v44 = vadd.f32 %v501_v43, %v861_v38 }
 0x23f   :  { %537 = vst.msk [vmem:[#allocation5 + $0x90] sm:$0xff] %vm58_vm0, %v502_v44 }
 0x240   :  { %555 = dma.vmem_to_hbm [thread:$0]  %s548_s15, 3072, %s550_s18, [#allocation4], %s699_s19, %s699_s19, %s700_s20  }
 0x241   :  { %693 = dma.done.wait [#allocation4], 3072  }
 0x242   :  { %694 = vsyncadd [#allocation4], 4294964224 }
 0x243   :  { %560 = vsyncpa [#allocation3], 1 }
 0x244   :  { %561 = vsyncpa [#allocation4], 1 }

</bundles_post_ra>
